<compile_context>
chip_gen: v6e
topology: v6e:2x2x1
jax: 0.10.0
libtpu: 0.0.40
codegen_flags: <defaults>
</compile_context>

<pallas_src>
import jax
import jax.numpy as jnp
from jax.experimental import pallas as pl
from jax.experimental.pallas import tpu as pltpu


def _round_up(n, m):
    return ((n + m - 1) // m) * m


def _cdiv(a, b):
    return (a + b - 1) // b


def _sublane(dtype):
    itemsize = jnp.dtype(dtype).itemsize
    if itemsize >= 4:
        return 8
    if itemsize == 2:
        return 16
    return 32


def _ffn_kernel(x_ref, w1_ref, b1_ref, w2_ref, b2_ref, o_ref, acc_ref):
    # x_ref:  [TM, d_model]
    # w1_ref: [d_model, TF], b1_ref: [1, TF]
    # w2_ref: [TF, d_model], b2_ref: [1, d_model]
    # o_ref:  [TM, d_model],  acc_ref: [TM, d_model] f32 scratch
    k = pl.program_id(1)

    @pl.when(k == 0)
    def _():
        acc_ref[...] = jnp.zeros_like(acc_ref)

    # First linear (this d_ff slab) + bias + ReLU; MXU matmul, f32 accumulate.
    h = jnp.dot(x_ref[...], w1_ref[...], preferred_element_type=jnp.float32)
    h = jnp.maximum(h + b1_ref[...].astype(jnp.float32), 0.0)
    # TODO(synk): dropout is eval-mode identity here (train-mode stochastic
    # dropout would use pltpu.prng_seed / pltpu.prng_random_bits).
    # Cast hidden to the weight dtype right after the ReLU so bf16 weights run
    # the MXU at bf16 rate and the [TM, TF] temporary stays narrow.
    h = h.astype(w2_ref.dtype)
    acc_ref[...] += jnp.dot(h, w2_ref[...], preferred_element_type=jnp.float32)

    @pl.when(k == pl.num_programs(1) - 1)
    def _():
        o_ref[...] = (acc_ref[...] + b2_ref[...].astype(jnp.float32)
                      ).astype(o_ref.dtype)


def positionwise_feed_forward(x, w1, b1, w2, b2, *,
                              block_tokens=None, block_ff=None):
    """x: [batch, seq, d_model]; w1: [d_model, d_ff]; w2: [d_ff, d_model]."""
    batch, seq, d_model = x.shape
    d_ff = w1.shape[1]
    tokens = batch * seq

    in_bytes = jnp.dtype(x.dtype).itemsize
    w_bytes = jnp.dtype(w1.dtype).itemsize
    sub = _sublane(x.dtype)

    # --- generation-aware VMEM budget -----------------------------------
    try:
        vmem_cap = int(pltpu.get_tpu_info().vmem_capacity_bytes)
    except Exception:
        vmem_cap = 64 * 1024 * 1024          # conservative (v7x per-TC VMEM)
    budget = (vmem_cap * 3) // 4             # headroom for Mosaic scratch
    vmem_cap_req = vmem_cap - 8 * 1024 * 1024

    def vmem_estimate(t, f):
        return (2 * t * d_model * in_bytes        # x tiles (double-buffered)
                + 2 * t * d_model * in_bytes      # out tiles
                + 2 * d_model * f * w_bytes       # w1 slab (double-buffered)
                + 2 * f * d_model * w_bytes       # w2 slab
                + 2 * (f + d_model) * w_bytes     # biases
                + t * d_model * 4                 # f32 accumulator scratch
                + t * f * (4 + w_bytes))          # f32 hidden + narrow cast

    # --- token tile (TM) selection ---------------------------------------
    if block_tokens is None:
        block_tokens = 1024 if in_bytes <= 2 else 512
    tm = min(int(block_tokens), _round_up(tokens, sub))
    if tokens > sub:
        # Keep >= 2 token tiles so v7x megacore can shard across both TCs.
        tm = min(tm, max(_round_up(_cdiv(tokens, 2), sub), sub))
    tm = max(_round_up(tm, sub), sub)

    # --- d_ff slab (TF) selection: stream weights before shrinking TM ----
    if block_ff is not None:
        assert d_ff % int(block_ff) == 0
        tf_candidates = [int(block_ff)]
    elif d_ff % 128 == 0:
        tf_candidates = [f for f in range(d_ff, 0, -128) if d_ff % f == 0]
    else:
        tf_candidates = [d_ff]

    tf = tf_candidates[-1]
    while True:
        chosen = None
        for cand in tf_candidates:                 # largest slab that fits
            if vmem_estimate(tm, cand) <= budget:
                chosen = cand
                break
        if chosen is not None:
            tf = chosen
            break
        if tm <= sub:                              # give up: minimum tiles
            tf = tf_candidates[-1]
            break
        tm = max(_round_up(tm // 2, sub), sub)     # only then shrink TM

    nk = d_ff // tf
    padded_tokens = _round_up(tokens, tm)
    ni = padded_tokens // tm

    # --- wrapper-side layout ---------------------------------------------
    x2d = x.reshape(tokens, d_model)
    if padded_tokens != tokens:
        # Extra copy only on ragged token counts; typical transformer
        # batch*seq are multiples of TM and skip this entirely.
        x2d = jnp.pad(x2d, ((0, padded_tokens - tokens), (0, 0)))
    b1_2d = b1.reshape(1, d_ff)
    b2_2d = b2.reshape(1, d_model)

    # Advisory cost estimate (weights re-read per token tile when streaming).
    weight_bytes = 2 * d_model * d_ff * w_bytes
    cost = pl.CostEstimate(
        flops=2 * 2 * tokens * d_model * d_ff,
        transcendentals=0,
        bytes_accessed=(2 * tokens * d_model * in_bytes
                        + weight_bytes * (ni if nk > 1 else 1)
                        + (d_ff + d_model) * w_bytes),
    )

    vmem_limit = int(min(max(vmem_estimate(tm, tf) * 5 // 4, 16 * 1024 * 1024),
                         vmem_cap_req))

    out2d = pl.pallas_call(
        _ffn_kernel,
        out_shape=jax.ShapeDtypeStruct((padded_tokens, d_model), x.dtype),
        grid_spec=pltpu.PrefetchScalarGridSpec(
            num_scalar_prefetch=0,
            grid=(ni, nk),
            in_specs=[
                # x: tiled over tokens, revisited across the d_ff axis.
                pl.BlockSpec((tm, d_model), lambda i, k: (i, 0)),
                # W1 / b1 / W2: streamed in d_ff slabs.
                pl.BlockSpec((d_model, tf), lambda i, k: (0, k)),
                pl.BlockSpec((1, tf), lambda i, k: (0, k)),
                pl.BlockSpec((tf, d_model), lambda i, k: (k, 0)),
                # b2: constant block.
                pl.BlockSpec((1, d_model), lambda i, k: (0, 0)),
            ],
            out_specs=pl.BlockSpec((tm, d_model), lambda i, k: (i, 0)),
            scratch_shapes=[pltpu.VMEM((tm, d_model), jnp.float32)],
        ),
        compiler_params=pltpu.CompilerParams(
            dimension_semantics=("parallel", "arbitrary"),
            vmem_limit_bytes=vmem_limit,
        ),
        cost_estimate=cost,
    )(x2d, w1, b1_2d, w2, b2_2d)

    if padded_tokens != tokens:
        out2d = out2d[:tokens]
    return out2d.reshape(batch, seq, d_model)


def _reference(x, w1, b1, w2, b2):
    h = jnp.maximum(
        jnp.dot(x, w1, precision=jax.lax.Precision.HIGHEST) + b1, 0.0)
    return jnp.dot(h, w2, precision=jax.lax.Precision.HIGHEST) + b2


if __name__ == "__main__":
    key = jax.random.PRNGKey(0)
    batch, seq, d_model, d_ff = 2, 8, 128, 256

    k_x, k_w1, k_b1, k_w2, k_b2, k_x2 = jax.random.split(key, 6)

    # nn.Linear-style init (uniform +/- 1/sqrt(fan_in)); weights stored
    # [in, out] (transposed relative to PyTorch's [out, in]).
    bound1 = 1.0 / (d_model ** 0.5)
    bound2 = 1.0 / (d_ff ** 0.5)
    w1 = jax.random.uniform(k_w1, (d_model, d_ff), jnp.float32, -bound1, bound1)
    b1 = jax.random.uniform(k_b1, (d_ff,), jnp.float32, -bound1, bound1)
    w2 = jax.random.uniform(k_w2, (d_ff, d_model), jnp.float32, -bound2, bound2)
    b2 = jax.random.uniform(k_b2, (d_model,), jnp.float32, -bound2, bound2)

    # 1) Default config: 2 token tiles (megacore-friendly), resident weights.
    x = jax.random.normal(k_x, (batch, seq, d_model), jnp.float32)
    out = positionwise_feed_forward(x, w1, b1, w2, b2)
    out = jax.block_until_ready(out)
    ref = _reference(x, w1, b1, w2, b2)
    assert out.shape == (batch, seq, d_model)
    assert jnp.allclose(out, ref, atol=1e-4, rtol=1e-4)

    # 2) Ragged token count (21 tokens, TM=8): tiling / pad / slice-back path.
    x_tail = jax.random.normal(k_x2, (3, 7, d_model), jnp.float32)
    out_tail = positionwise_feed_forward(x_tail, w1, b1, w2, b2,
                                         block_tokens=8)
    out_tail = jax.block_until_ready(out_tail)
    ref_tail = _reference(x_tail, w1, b1, w2, b2)
    assert out_tail.shape == (3, 7, d_model)
    assert jnp.allclose(out_tail, ref_tail, atol=1e-4, rtol=1e-4)

    # 3) Force d_ff streaming (TF=128, 2 reduction steps): accumulator path.
    out_stream = positionwise_feed_forward(x, w1, b1, w2, b2, block_ff=128)
    out_stream = jax.block_until_ready(out_stream)
    assert jnp.allclose(out_stream, ref, atol=1e-4, rtol=1e-4)

    # 4) bf16 inputs/weights (16-sublane tiles, bf16 MXU path, f32 accumulate).
    xb, w1b, b1b = x.astype(jnp.bfloat16), w1.astype(jnp.bfloat16), b1.astype(jnp.bfloat16)
    w2b, b2b = w2.astype(jnp.bfloat16), b2.astype(jnp.bfloat16)
    out_bf16 = positionwise_feed_forward(xb, w1b, b1b, w2b, b2b)
    out_bf16 = jax.block_until_ready(out_bf16)
    ref_bf16 = _reference(xb.astype(jnp.float32), w1b.astype(jnp.float32),
                          b1b.astype(jnp.float32), w2b.astype(jnp.float32),
                          b2b.astype(jnp.float32))
    assert jnp.allclose(out_bf16.astype(jnp.float32), ref_bf16,
                        atol=2e-2, rtol=2e-2)

    print("KERNEL_OK")
</pallas_src>

<mosaic_0001>
module attributes {stable_mosaic.version = 11 : i64} {
  func.func @_ffn_kernel(%arg0: i32, %arg1: i32, %arg2: memref<8x128xf32, #tpu.memory_space<vmem>>, %arg3: memref<128x256xf32, #tpu.memory_space<vmem>>, %arg4: memref<1x256xf32, #tpu.memory_space<vmem>>, %arg5: memref<256x128xf32, #tpu.memory_space<vmem>>, %arg6: memref<1x128xf32, #tpu.memory_space<vmem>>, %arg7: memref<8x128xf32, #tpu.memory_space<vmem>>, %arg8: memref<8x128xf32, #tpu.memory_space<vmem>>) attributes {dimension_semantics = [#tpu.dimension_semantics<parallel>, #tpu.dimension_semantics<arbitrary>], iteration_bounds = array<i64: 2, 1>, scalar_prefetch = 0 : i64, scratch_operands = 1 : i64, tpu.core_type = #tpu.core_type<tc>, window_params = [{transform_indices = @transform_0, window_bounds = array<i64: 8, 128>}, {transform_indices = @transform_1, window_bounds = array<i64: 128, 256>}, {transform_indices = @transform_2, window_bounds = array<i64: 1, 256>}, {transform_indices = @transform_3, window_bounds = array<i64: 256, 128>}, {pipeline_mode = #tpu.pipeline_mode<synchronous>, transform_indices = @transform_4, window_bounds = array<i64: 1, 128>}, {transform_indices = @transform_5, window_bounds = array<i64: 8, 128>}]} {
    %c0_i32 = arith.constant 0 : i32
    %0 = arith.cmpi eq, %arg1, %c0_i32 : i32
    %1 = arith.extui %0 : i1 to i32
    %c0_i32_0 = arith.constant 0 : i32
    %2 = arith.cmpi ne, %1, %c0_i32_0 : i32
    scf.if %2 {
      %cst_16 = arith.constant 0.000000e+00 : f32
      %19 = vector.broadcast %cst_16 : f32 to vector<8x128xf32>
      %c0_17 = arith.constant 0 : index
      %c0_18 = arith.constant 0 : index
      %20 = vector.load %arg8[%c0_17, %c0_18] : memref<8x128xf32, #tpu.memory_space<vmem>>, vector<8x128xf32>
      tpu.vector_store %arg8[%c0_17, %c0_18], %19 {strides = array<i32>} : memref<8x128xf32, #tpu.memory_space<vmem>>, vector<8x128xf32>,
    } else {
    }
    %c0 = arith.constant 0 : index
    %c0_1 = arith.constant 0 : index
    %3 = vector.load %arg2[%c0, %c0_1] : memref<8x128xf32, #tpu.memory_space<vmem>>, vector<8x128xf32>
    %c0_2 = arith.constant 0 : index
    %c0_3 = arith.constant 0 : index
    %4 = vector.load %arg3[%c0_2, %c0_3] : memref<128x256xf32, #tpu.memory_space<vmem>>, vector<128x256xf32>
    %cst = arith.constant dense<0.000000e+00> : vector<8x256xf32>
    %5 = tpu.matmul %3, %4, %cst {dimension_numbers = #tpu.dot_dimension_numbers<[1], [0], [0], [1], [0, 0, 1, 1], [], []>} : vector<8x128xf32>, vector<128x256xf32>, vector<8x256xf32> -> vector<8x256xf32>
    %c0_4 = arith.constant 0 : index
    %c0_5 = arith.constant 0 : index
    %6 = vector.load %arg4[%c0_4, %c0_5] : memref<1x256xf32, #tpu.memory_space<vmem>>, vector<1x256xf32>
    %7 = vector.broadcast %6 : vector<1x256xf32> to vector<8x256xf32>
    %8 = arith.addf %5, %7 : vector<8x256xf32>
    %cst_6 = arith.constant 0.000000e+00 : f32
    %9 = vector.broadcast %cst_6 : f32 to vector<8x256xf32>
    %10 = arith.maximumf %8, %9 : vector<8x256xf32>
    %c0_7 = arith.constant 0 : index
    %c0_8 = arith.constant 0 : index
    %11 = vector.load %arg8[%c0_7, %c0_8] : memref<8x128xf32, #tpu.memory_space<vmem>>, vector<8x128xf32>
    %c0_9 = arith.constant 0 : index
    %c0_10 = arith.constant 0 : index
    %12 = vector.load %arg5[%c0_9, %c0_10] : memref<256x128xf32, #tpu.memory_space<vmem>>, vector<256x128xf32>
    %cst_11 = arith.constant dense<0.000000e+00> : vector<8x128xf32>
    %13 = tpu.matmul %10, %12, %cst_11 {dimension_numbers = #tpu.dot_dimension_numbers<[1], [0], [0], [1], [0, 0, 1, 1], [], []>} : vector<8x256xf32>, vector<256x128xf32>, vector<8x128xf32> -> vector<8x128xf32>
    %14 = arith.addf %11, %13 : vector<8x128xf32>
    %c0_12 = arith.constant 0 : index
    %c0_13 = arith.constant 0 : index
    %15 = vector.load %arg8[%c0_12, %c0_13] : memref<8x128xf32, #tpu.memory_space<vmem>>, vector<8x128xf32>
    tpu.vector_store %arg8[%c0_12, %c0_13], %14 {strides = array<i32>} : memref<8x128xf32, #tpu.memory_space<vmem>>, vector<8x128xf32>,
    %c0_i32_14 = arith.constant 0 : i32
    %16 = arith.cmpi eq, %arg1, %c0_i32_14 : i32
    %17 = arith.extui %16 : i1 to i32
    %c0_i32_15 = arith.constant 0 : i32
    %18 = arith.cmpi ne, %17, %c0_i32_15 : i32
    scf.if %18 {
      %c0_16 = arith.constant 0 : index
      %c0_17 = arith.constant 0 : index
      %19 = vector.load %arg8[%c0_16, %c0_17] : memref<8x128xf32, #tpu.memory_space<vmem>>, vector<8x128xf32>
      %c0_18 = arith.constant 0 : index
      %c0_19 = arith.constant 0 : index
      %20 = vector.load %arg6[%c0_18, %c0_19] : memref<1x128xf32, #tpu.memory_space<vmem>>, vector<1x128xf32>
      %21 = vector.broadcast %20 : vector<1x128xf32> to vector<8x128xf32>
      %22 = arith.addf %19, %21 : vector<8x128xf32>
      %c0_20 = arith.constant 0 : index
      %c0_21 = arith.constant 0 : index
      %23 = vector.load %arg7[%c0_20, %c0_21] : memref<8x128xf32, #tpu.memory_space<vmem>>, vector<8x128xf32>
      tpu.vector_store %arg7[%c0_20, %c0_21], %22 {strides = array<i32>} : memref<8x128xf32, #tpu.memory_space<vmem>>, vector<8x128xf32>,
    } else {
    }
    return
  }
  func.func @transform_0(%arg0: i32, %arg1: i32) -> (i32, i32) {
    %c0_i32 = arith.constant 0 : i32
    %c0_i32_0 = arith.constant 0 : i32
    return %arg0, %c0_i32 : i32, i32
  }
  func.func @transform_1(%arg0: i32, %arg1: i32) -> (i32, i32) {
    %c0_i32 = arith.constant 0 : i32
    %c0_i32_0 = arith.constant 0 : i32
    return %c0_i32, %arg1 : i32, i32
  }
  func.func @transform_2(%arg0: i32, %arg1: i32) -> (i32, i32) {
    %c0_i32 = arith.constant 0 : i32
    %c0_i32_0 = arith.constant 0 : i32
    return %c0_i32, %arg1 : i32, i32
  }
  func.func @transform_3(%arg0: i32, %arg1: i32) -> (i32, i32) {
    %c0_i32 = arith.constant 0 : i32
    %c0_i32_0 = arith.constant 0 : i32
    return %arg1, %c0_i32 : i32, i32
  }
  func.func @transform_4(%arg0: i32, %arg1: i32) -> (i32, i32) {
    %c0_i32 = arith.constant 0 : i32
    %c0_i32_0 = arith.constant 0 : i32
    %c0_i32_1 = arith.constant 0 : i32
    return %c0_i32, %c0_i32_0 : i32, i32
  }
  func.func @transform_5(%arg0: i32, %arg1: i32) -> (i32, i32) {
    %c0_i32 = arith.constant 0 : i32
    %c0_i32_0 = arith.constant 0 : i32
    return %arg0, %c0_i32 : i32, i32
  }
}

</mosaic_0001>

<bundles_post_ra>
// kernel: tpu_custom_call.1
= control target key start
LH: loop header
LB: loop body
LE: loop exit
PB: predicated region body
PF: predicated region fallthrough
CT: control target
= control target key end

     0   :  { %s1220_s0 = inlined_call_operand.hbm [shape: f32[16,128], index: 0, kind: input, shape index: {}]   ;;  %s1221_s1 = inlined_call_operand.hbm [shape: f32[128,256], index: 1, kind: input, shape index: {}]   ;;  %s1222_s2 = inlined_call_operand.vmem [shape: f32[1,256], index: 2, kind: input, shape index: {}]   ;;  %s1223_s3 = inlined_call_operand.hbm [shape: f32[256,128], index: 3, kind: input, shape index: {}]   ;;  %s1224_s4 = inlined_call_operand.vmem [shape: f32[1,128], index: 4, kind: input, shape index: {}]   ;;  %s1225_s5 = inlined_call_operand.hbm [shape: f32[16,128], index: 5, kind: output, shape index: {}]  }
   0x1   :  { %1229 = sst [smem:[#allocation13_spill]] %s1221_s1 }
   0x2   :  { %10 = vsyncpa [#allocation4], 0 }
   0x3   :  { %12 = vsyncpa [#allocation4 + $0x1], 0 }
   0x4   :  { %13 = vsyncpa [#allocation7], 0 }
   0x5   :  { %14 = vsyncpa [#allocation5], 0 }
   0x6   :  { %16 = vsyncpa [#allocation5 + $0x1], 0  ;;  %s1033_s18 = smov 0   ;;  %s1035_s19 = smov 0  }
   0x7   :  { %s1037_s20 = smov 0   ;;  %s1039_s21 = smov 0  }
   0x8   :  { %s1041_s22 = smov 0   ;;  %s1043_s23 = smov 0  }
   0x9 LB: > { %s686_s24 = sadd.s32 4294967295, %s992_s23   ;;  %s687_s25 = sadd.s32 4294967294, %s992_s23   ;;  %s992_s23 = sphi %s1043_s23, %s22_s23   ;;  %s988_s22 = sphi %s1041_s22, %s1247_s22   ;;  %s984_s21 = sphi %s1039_s21, %s1246_s21   ;;  %s980_s20 = sphi %s1037_s20, %s1245_s20   ;;  %s976_s19 = sphi %s1035_s19, %s1244_s19   ;;  %s972_s18 = sphi %s1033_s18, %s1243_s18  }
   0xa   : > { %p54_p0 = scmp.ne.s32.totalorder %s976_s19, %s972_s18  ;;  %p1067_p1 = scmp.eq.s32.totalorder %s686_s24, 0 }
   0xb   : > { %p1071_p2 = scmp.eq.s32.totalorder %s686_s24, 1  ;;  %p183_p3 = scmp.eq.s32.totalorder %s687_s25, 1 }
   0xc   : > { %s1230_s26 = scalar_select %p1067_p1, 1, 0 }
   0xd   : > { %p1077_p4 = por %p1067_p1, %p54_p0  ;;  %p688_p5 = scmp.ge.s32.totalorder %s992_s23, 1 }
   0xe   : > { %p1082_p6 = por %p183_p3, %p54_p0  ;;  %p190_p7 = scmp.lt.s32.totalorder %s992_s23, 3 }
   0xf   : > { %s1232_s28 = scalar_select %p1077_p4, 1, 0 }
  0x10   : > { %s1233_s29 = scalar_select %p1082_p6, 1, 0 }
  0x11   : > { %p1087_p8 = pnand %p688_p5, %p190_p7  ;;  %s994_s6 = smov [#allocation6]  }
  0x12   : > { %s205_s7 = sshll.u32 %s994_s6, 4  ;;  %s995_s9 = smov [#allocation8]   ;;  %s206_s7 = int_to_ptr.vmem [resolvable:$true] %s205_s7 }
  0x13   : > { %p752_p9 = pneg %p1087_p8  ;;  %s229_s10 = sshll.u32 %s995_s9, 4  ;;  %s230_s10 = int_to_ptr.vmem [resolvable:$true] %s229_s10 }
  0x14   : > { %s839_s11 = scalar_lea.vmem %s206_s7, 4096  ;;  %p847_p5 = scmp.lt.s32.totalorder %s206_s7, %s206_s7 }
  0x15   : > { %p1096_p11 = pnand %p752_p9, %p1067_p1  ;;  %p840_p13 = scmp.ne.s32.totalorder %s206_s7, %s839_s11 }
  0x16   : > { %p848_p7 = scmp.lt.s32.totalorder %s839_s11, %s839_s11 }
  0x17   : > { %p830_p12 = pneg %p1096_p11 }
  0x18   : > { %p849_p10 = por %p848_p7, %p847_p5 }
  0x19   : > { %p842_p0 = pnand %p840_p13, %p830_p12 }
  0x1b   : > { %p843_p3 = pneg %p842_p0 }
  0x1d   : > { %p850_p9 = pnand %p849_p10, %p843_p3 }
  0x1f   : > { %853 = shalt.err (!%p850_p9)
}
  0x20   : > { %s996_s12 = smov 256   ;;  %s997_s13 = smov 16  }
  0x21   : > { %s1236_s1 = sld [smem:[#allocation13_spill]]  ;;  %s865_s16 = scalar_lea.vmem %s230_s10, 4096 }
  0x22   : > { %p866_p6 = scmp.ne.s32.totalorder %s230_s10, %s865_s16  ;;  %p873_p1 = scmp.lt.s32.totalorder %s230_s10, %s230_s10 }
  0x23   : > { %p874_p4 = scmp.lt.s32.totalorder %s865_s16, %s865_s16 }
  0x24   : > { %p868_p13 = pnand %p866_p6, %p830_p12 }
  0x25   : > { %p875_p5 = por %p874_p4, %p873_p1 }
  0x26   : > { %p869_p0 = pneg %p868_p13 }
  0x27   : > { %755 = dma.hbm_to_vmem [thread:$0]  (!%p1096_p11), %s1236_s1, 4096, %s206_s7, [#allocation7], %s996_s12, %s996_s12, %s997_s13  }
  0x28   : > { %p876_p10 = pnand %p875_p5, %p869_p0 }
  0x2a   : > { %879 = shalt.err (!%p876_p10)
}
  0x2b   : > { %s998_s17 = smov 128   ;;  %s999_s24 = smov 8  }
  0x2c   : > { %758 = dma.hbm_to_vmem [thread:$0]  (!%p1096_p11), %s1223_s3, 4096, %s230_s10, [#allocation7], %s998_s17, %s998_s17, %s999_s24  }
  0x2d   : > { %s34_s7 = sadd.s32 1, %s988_s22  ;;  %s41_s9 = sadd.s32 1, %s980_s20 }
  0x2e   : > { %p36_p1 = scmp.ge.s32.totalorder %s34_s7, 2  ;;  %p48_p4 = scmp.ne.s32.totalorder %s980_s20, %s976_s19 }
  0x2f   : > { %p49_p6 = scmp.eq.s32.totalorder %s992_s23, 0  ;;  %p769_p12 = scmp.lt.s32.totalorder %s992_s23, 2 }
  0x30   : > { %s1249_s7 = smov (%p36_p1, %s34_s7), 0  ;;  %p1128_p7 = por %p1071_p2, %p48_p4 }
  0x31   : > { %p50_p3 = por %p49_p6, %p48_p4  ;;  %s38_s8 = ssub.s32 %s988_s22, %s1249_s7 }
  0x32   : > { %s246_s12 = sand.u32 1, %s980_s20   ;;  %p39_p9 = scmp.eq.s32.totalorder %s38_s8, 0 }
  0x33   : > { %s693_s10 = sshll.u32 %s246_s12, 3  ;;  %s694_s13 = sshll.u32 %s988_s22, 7 }
  0x34   : > { %s1137_s14 = scalar_select %p39_p9, %s980_s20, %s41_s9  }
  0x35   : > { %s255_s17 = scalar_lea.hbm %s1220_s0, %s694_s13  ;;  %s250_s24 = scalar_lea.vmem [#allocation3], %s693_s10 }
  0x36   : > { %s257_s25 = sshll.u32 %s250_s24, 4  ;;  %p1144_p11 = pnand %p769_p12, %p50_p3  ;;  %s258_s25 = int_to_ptr.vmem [resolvable:$true] %s257_s25 }
  0x37   : > { %s247_s6 = scalar_lea.sflag [#allocation4], %s246_s12  ;;  %s893_s8 = scalar_lea.vmem %s258_s25, 128 }
  0x38   : > { %p882_p2 = pneg %p1144_p11  ;;  %p894_p13 = scmp.ne.s32.totalorder %s258_s25, %s893_s8 }
  0x39   : > { %s1000_s9 = smov [#allocation3]  }
  0x3a   : > { %p896_p0 = pnand %p894_p13, %p882_p2  ;;  %s898_s1 = sshll.u32 %s1000_s9, 4  ;;  %s899_s1 = int_to_ptr.vmem [resolvable:$false] %s898_s1 }
  0x3b   : > { %s900_s13 = scalar_lea.vmem %s899_s1, 256  ;;  %p901_p10 = scmp.lt.s32.totalorder %s258_s25, %s899_s1 }
  0x3c   : > { %p897_p5 = pneg %p896_p0  ;;  %p902_p1 = scmp.lt.s32.totalorder %s900_s13, %s893_s8 }
  0x3e   : > { %p903_p4 = por %p902_p1, %p901_p10 }
  0x40   : > { %p904_p6 = pnand %p903_p4, %p897_p5 }
  0x42   : > { %907 = shalt.err (!%p904_p6)
}
  0x43   : > { %762 = dma.hbm_to_vmem [thread:$0]  (!%p1144_p11), %s255_s17, 128, %s258_s25, %s247_s6  }
  0x44   : > { %266 = sbr.rel (%p1087_p8) target bundleno = 522 (0x20a), region = 40  ;;  %s1155_s12 = sand.u32 (!%p1087_p8), 1, %s976_s19  }
  0x45   : > { %s696_s10 = sshll.u32 (!%p1087_p8), %s1155_s12, 3  ;;  %s269_s15 = scalar_lea.sflag (!%p1087_p8), [#allocation4], %s1155_s12 }
  0x46   : > { %s1161_s1 = scalar_lea.vmem (!%p1087_p8), [#allocation3], %s696_s10  ;;  %p1239_p12 = scmp.ne.s32.totalorder (!%p1087_p8), %s1232_s28, 0 }
  0x49   : > { %959 = dma.done.wait (%p1239_p12), %s269_s15, 128  }
  0x4a   : > { %961 = vsyncadd (%p1239_p12), %s269_s15, 4294967168  ;;  %p1240_p3 = scmp.ne.s32.totalorder %s1230_s26, 0 }
  0x4c   : > { %963 = dma.done.wait (%p1240_p3), [#allocation7], 8192  }
  0x4d   : > { %965 = vsyncadd (%p1240_p3), [#allocation7], 4294959104  ;;  %v1001_v0 = vmov 0.0   ;;  %v355_v1 = vld [vmem:[#allocation6 + $0xf8] sm:$0xff]  ;;  %v354_v2 = vld [vmem:[#allocation6 + $0xf0] sm:$0xff]  ;;  %s702_s17 = sshll.u32 %s984_s21, 7 }
  0x4e   : > { %432 = vmatprep.mubr.f32.mxu0 %v1001_v0  ;;  %v353_v3 = vld [vmem:[#allocation6 + $0xe8] sm:$0xff]  ;;  %368 = vmatprep.subr.mxu0 %v355_v1  ;;  %v352_v4 = vld [vmem:[#allocation6 + $0xe0] sm:$0xff]  ;;  %v351_v5 = vld [vmem:[#allocation6 + $0xd8] sm:$0xff]  ;;  %s310_s24 = scalar_lea.vmem [#allocation9], %s696_s10  ;;  %s571_s8 = scalar_lea.hbm %s1225_s5, %s702_s17 }
  0x4f   : > { %369 = vmatpush1.msra.mxu0 %v354_v2  ;;  %v350_v6 = vld [vmem:[#allocation6 + $0xd0] sm:$0xff]  ;;  %v349_v7 = vld [vmem:[#allocation6 + $0xc8] sm:$0xff]  ;;  %v348_v8 = vld [vmem:[#allocation6 + $0xc0] sm:$0xff]  ;;  %v358_v2 = vlaneseq  ;;  %s573_s25 = sshll.u32 %s310_s24, 4  ;;  %s560_s9 = scalar_lea.sflag [#allocation5], %s1155_s12  ;;  %s574_s25 = int_to_ptr.vmem [resolvable:$true] %s573_s25 }
  0x50   : > { %370 = vmatprep.subr.mxu0 %v353_v3  ;;  %v347_v9 = vld [vmem:[#allocation6 + $0xb8] sm:$0xff]  ;;  %v346_v10 = vld [vmem:[#allocation6 + $0xb0] sm:$0xff]  ;;  %v345_v11 = vld [vmem:[#allocation6 + $0xa8] sm:$0xff]  ;;  %s908_s13 = scalar_lea.vmem %s574_s25, 128  ;;  %s1002_s15 = smov [#allocation9]  }
  0x51   : > { %371 = vmatpush1.msra.mxu0 %v352_v4  ;;  %v344_v12 = vld [vmem:[#allocation6 + $0xa0] sm:$0xff]  ;;  %v343_v13 = vld [vmem:[#allocation6 + $0x98] sm:$0xff]  ;;  %v342_v14 = vld [vmem:[#allocation6 + $0x90] sm:$0xff]  ;;  %v359_v3 = vshrl.u32 %v358_v2, 7  ;;  %p909_p8 = scmp.ne.s32.totalorder %s574_s25, %s908_s13 }
  0x52   : > { %372 = vmatprep.subr.mxu0 %v351_v5  ;;  %v473_v15 = vld [vmem:[#allocation8 + $0xf8] sm:$0xff]  ;;  %v472_v17 = vld [vmem:[#allocation8 + $0xf0] sm:$0xff]  ;;  %v341_v18 = vld [vmem:[#allocation6 + $0x88] sm:$0xff] }
  0x53   : > { %373 = vmatpush1.msra.mxu0 %v350_v6  ;;  %v457_v16 = vld [vmem:[#allocation8 + $0x78] sm:$0xff]  ;;  %705 = vmatprep.subr.mxu1 %v473_v15  ;;  %v456_v19 = vld [vmem:[#allocation8 + $0x70] sm:$0xff]  ;;  %v340_v20 = vld [vmem:[#allocation6 + $0x80] sm:$0xff]  ;;  %v360_v4 = vsub.s32 0, %v359_v3  ;;  %v364_v6 = vsub.s32 1, %v359_v3  ;;  %p910_p9 = pnand %p909_p8, %p1128_p7 }
  0x54   : > { %374 = vmatprep.subr.mxu0 %v349_v7  ;;  %706 = vmatpush3.msra.mxu1 %v457_v16  ;;  %v471_v21 = vld [vmem:[#allocation8 + $0xe8] sm:$0xff]  ;;  %v339_v22 = vld [vmem:[#allocation6 + $0x78] sm:$0xff]  ;;  %v338_v24 = vld [vmem:[#allocation6 + $0x70] sm:$0xff] }
  0x55   : > { %375 = vmatpush1.msra.mxu0 %v348_v8  ;;  %707 = vmatprep.subr.mxu1 %v472_v17  ;;  %v455_v23 = vld [vmem:[#allocation8 + $0x68] sm:$0xff]  ;;  %v470_v25 = vld [vmem:[#allocation8 + $0xe0] sm:$0xff]  ;;  %v469_v29 = vld [vmem:[#allocation8 + $0xd8] sm:$0xff]  ;;  %p911_p11 = pneg %p910_p9 }
  0x56   : > { %376 = vmatprep.subr.mxu0 %v347_v9  ;;  %708 = vmatpush3.msra.mxu1 %v456_v19  ;;  %v337_v26 = vld [vmem:[#allocation6 + $0x68] sm:$0xff]  ;;  %v454_v27 = vld [vmem:[#allocation8 + $0x60] sm:$0xff]  ;;  %v335_v30 = vld [vmem:[#allocation6 + $0x58] sm:$0xff] }
  0x57   : > { %377 = vmatpush1.msra.mxu0 %v346_v10  ;;  %709 = vmatprep.subr.mxu1 %v471_v21  ;;  %v336_v28 = vld [vmem:[#allocation6 + $0x60] sm:$0xff]  ;;  %v453_v31 = vld [vmem:[#allocation8 + $0x58] sm:$0xff]  ;;  %v334_v32 = vld [vmem:[#allocation6 + $0x50] sm:$0xff] }
  0x58   : > { %378 = vmatprep.subr.mxu0 %v345_v11  ;;  %710 = vmatpush3.msra.mxu1 %v455_v23  ;;  %v468_v33 = vld [vmem:[#allocation8 + $0xd0] sm:$0xff]  ;;  %v333_v34 = vld [vmem:[#allocation6 + $0x48] sm:$0xff]  ;;  %v332_v36 = vld [vmem:[#allocation6 + $0x40] sm:$0xff] }
  0x59   : > { %379 = vmatpush1.msra.mxu0 %v344_v12  ;;  %711 = vmatprep.subr.mxu1 %v470_v25  ;;  %v452_v35 = vld [vmem:[#allocation8 + $0x50] sm:$0xff]  ;;  %v467_v37 = vld [vmem:[#allocation8 + $0xc8] sm:$0xff]  ;;  %v331_v38 = vld [vmem:[#allocation6 + $0x38] sm:$0xff] }
  0x5a   : > { %380 = vmatprep.subr.mxu0 %v343_v13  ;;  %712 = vmatpush3.msra.mxu1 %v454_v27  ;;  %v451_v39 = vld [vmem:[#allocation8 + $0x48] sm:$0xff]  ;;  %v330_v40 = vld [vmem:[#allocation6 + $0x30] sm:$0xff]  ;;  %v466_v41 = vld [vmem:[#allocation8 + $0xc0] sm:$0xff] }
  0x5b   : > { %381 = vmatpush1.msra.mxu0 %v342_v14  ;;  %713 = vmatprep.subr.mxu1 %v469_v29  ;;  %v329_v42 = vld [vmem:[#allocation6 + $0x28] sm:$0xff]  ;;  %v450_v43 = vld [vmem:[#allocation8 + $0x40] sm:$0xff]  ;;  %v465_v45 = vld [vmem:[#allocation8 + $0xb8] sm:$0xff] }
  0x5c   : > { %382 = vmatprep.subr.mxu0 %v341_v18  ;;  %714 = vmatpush3.msra.mxu1 %v453_v31  ;;  %v328_v44 = vld [vmem:[#allocation6 + $0x20] sm:$0xff]  ;;  %v327_v46 = vld [vmem:[#allocation6 + $0x18] sm:$0xff]  ;;  %v326_v48 = vld [vmem:[#allocation6 + $0x10] sm:$0xff] }
  0x5d   : > { %383 = vmatpush1.msra.mxu0 %v340_v20  ;;  %715 = vmatprep.subr.mxu1 %v468_v33  ;;  %v449_v47 = vld [vmem:[#allocation8 + $0x38] sm:$0xff]  ;;  %v464_v49 = vld [vmem:[#allocation8 + $0xb0] sm:$0xff]  ;;  %v325_v50 = vld [vmem:[#allocation6 + $0x8] sm:$0xff] }
  0x5e   : > { %384 = vmatprep.subr.mxu0 %v339_v22  ;;  %716 = vmatpush3.msra.mxu1 %v452_v35  ;;  %v448_v51 = vld [vmem:[#allocation8 + $0x30] sm:$0xff]  ;;  %v324_v52 = vld [vmem:[#allocation6] sm:$0xff]  ;;  %v463_v53 = vld [vmem:[#allocation8 + $0xa8] sm:$0xff] }
  0x5f   : > { %385 = vmatpush1.msra.mxu0 %v338_v24  ;;  %717 = vmatprep.subr.mxu1 %v467_v37  ;;  %v323_v54 = vld [vmem:[%s1161_s1] sm:$0xff]  ;;  %v447_v55 = vld [vmem:[#allocation8 + $0x28] sm:$0xff]  ;;  %v462_v56 = vld [vmem:[#allocation8 + $0xa0] sm:$0xff]  ;;  %s912_s1 = sshll.u32 %s1002_s15, 4  ;;  %s913_s1 = int_to_ptr.vmem [resolvable:$false] %s912_s1 }
  0x60   : > { %386 = vmatprep.subr.mxu0 %v337_v26  ;;  %718 = vmatpush3.msra.mxu1 %v451_v39  ;;  %v446_v57 = vld [vmem:[#allocation8 + $0x20] sm:$0xff]  ;;  %v461_v58 = vld [vmem:[#allocation8 + $0x98] sm:$0xff]  ;;  %v460_v60 = vld [vmem:[#allocation8 + $0x90] sm:$0xff]  ;;  %s914_s21 = scalar_lea.vmem %s913_s1, 256  ;;  %p915_p2 = scmp.lt.s32.totalorder %s574_s25, %s913_s1 }
  0x61   : > { %387 = vmatpush1.msra.mxu0 %v336_v28  ;;  %719 = vmatprep.subr.mxu1 %v466_v41  ;;  %v445_v59 = vld [vmem:[#allocation8 + $0x18] sm:$0xff]  ;;  %v444_v61 = vld [vmem:[#allocation8 + $0x10] sm:$0xff]  ;;  %v459_v62 = vld [vmem:[#allocation8 + $0x88] sm:$0xff]  ;;  %p916_p13 = scmp.lt.s32.totalorder %s914_s21, %s908_s13 }
  0x62   : > { %388 = vmatprep.subr.mxu0 %v335_v30  ;;  %720 = vmatpush3.msra.mxu1 %v450_v43  ;;  %v443_v63 = vld [vmem:[#allocation8 + $0x8] sm:$0xff]  ;;  %v458_v0 = vld [vmem:[#allocation8 + $0x80] sm:$0xff]  ;;  %v356_v5 = vld [vmem:[%s1222_s2] sm:$0x3] }
  0x63   : > { %389 = vmatpush1.msra.mxu0 %v334_v32  ;;  %721 = vmatprep.subr.mxu1 %v465_v45  ;;  %v442_v1 = vld [vmem:[#allocation8] sm:$0xff]  ;;  %v361_v7 = vrot.slane %v356_v5, %v360_v4  ;;  %v365_v8 = vrot.slane %v356_v5, %v364_v6  ;;  %v700_v17 = vld [vmem:[%s1224_s4] ss:$0 sm:$0xff]  ;;  %p917_p0 = por %p916_p13, %p915_p2 }
  0x64   : > { %390 = vmatprep.subr.mxu0 %v333_v34  ;;  %722 = vmatpush3.msra.mxu1 %v449_v47 }
  0x65   : > { %391 = vmatpush1.msra.mxu0 %v332_v36  ;;  %723 = vmatprep.subr.mxu1 %v464_v49  ;;  %p918_p5 = pnand %p917_p0, %p911_p11 }
  0x66   : > { %392 = vmatprep.subr.mxu0 %v331_v38  ;;  %724 = vmatpush3.msra.mxu1 %v448_v51 }
  0x67   : > { %393 = vmatpush1.msra.mxu0 %v330_v40  ;;  %725 = vmatprep.subr.mxu1 %v463_v53 }
  0x68   : > { %394 = vmatprep.subr.mxu0 %v329_v42  ;;  %726 = vmatpush3.msra.mxu1 %v447_v55 }
  0x69   : > { %395 = vmatpush1.msra.mxu0 %v328_v44  ;;  %727 = vmatprep.subr.mxu1 %v462_v56 }
  0x6a   : > { %396 = vmatprep.subr.mxu0 %v327_v46  ;;  %728 = vmatpush3.msra.mxu1 %v446_v57 }
  0x6b   : > { %397 = vmatpush1.msra.mxu0 %v326_v48  ;;  %729 = vmatprep.subr.mxu1 %v461_v58 }
  0x6c   : > { %398 = vmatprep.subr.mxu0 %v325_v50  ;;  %730 = vmatpush3.msra.mxu1 %v445_v59 }
  0x6d   : > { %399 = vmatpush1.msra.mxu0 %v324_v52  ;;  %731 = vmatprep.subr.mxu1 %v460_v60 }
  0x6e   : > { %433 = vmatmul.mubr.f32.vlgmr.msra.gmra.mxu0 %v323_v54  ;;  %732 = vmatpush3.msra.mxu1 %v444_v61 }
  0x6f   : > { %733 = vmatprep.subr.mxu1 %v459_v62 }
  0x70   : > { %734 = vmatpush3.msra.mxu1 %v443_v63 }
  0x71   : > { %735 = vmatprep.subr.mxu1 %v458_v0 }
  0x72   : > { %736 = vmatpush3.msra.mxu1 %v442_v1 }
 0x12e   : > { %v434_v9 = vpop.f32.mrf.mxu0 }
 0x12f   : > { %v435_v10 = vadd.f32 %v434_v9, %v361_v7 }
 0x130   : > { %v436_v11 = vpop.f32.mrf.mxu0 }
 0x131   : > { %v437_v12 = vadd.f32 %v436_v11, %v365_v8  ;;  %v439_v14 = vmax.f32 %v435_v10, 0.0 }
 0x133   : > { %v440_v13 = vmax.f32 %v437_v12, 0.0 }
 0x135   : > { %538 = vmatprep.mubr.f32.mxu1 %v440_v13 }
 0x136   : > { %539 = vmatmul.mubr.f32.vlgmr.msra.gmra.mxu1 %v439_v14 }
 0x1f6   : > { %v737_v15 = vpop.f32.mrf.mxu1 }
 0x1f8   : > { %v738_v16 = vpop.f32.mrf.mxu1 }
 0x1f9   : > { %v739_v18 = vadd.f32 %v738_v16, %v737_v15 }
 0x1fb   : > { %v557_v19 = vadd.f32 %v739_v18, %v700_v17 }
 0x1fd   : > { %558 = vst [vmem:[%s310_s24] sm:$0xff] %v557_v19 }
 0x1fe   : > { %921 = shalt.err (!%p918_p5)
}
 0x1ff   : > { %s922_s10 = scalar_lea.hbm %s571_s8, 128  ;;  %s926_s28 = scalar_lea.hbm %s1225_s5, 256 }
 0x200   : > { %p923_p10 = scmp.ne.s32.totalorder %s571_s8, %s922_s10  ;;  %p927_p6 = scmp.lt.s32.totalorder %s571_s8, %s1225_s5 }
 0x201   : > { %p928_p12 = scmp.lt.s32.totalorder %s926_s28, %s922_s10 }
 0x202   : > { %p924_p1 = pnand %p923_p10, %p1128_p7 }
 0x203   : > { %p929_p3 = por %p928_p12, %p927_p6 }
 0x204   : > { %p925_p4 = pneg %p924_p1 }
 0x206   : > { %p930_p8 = pnand %p929_p3, %p925_p4 }
 0x208   : > { %933 = shalt.err (!%p930_p8)
}
 0x209   : > { %750 = dma.vmem_to_hbm [thread:$0]  (%p1128_p7), %s574_s25, 128, %s571_s8, %s560_s9  }
 0x20a PF: > { %s585_s17 = sand.u32 1, %s972_s18   ;;  %p1241_p9 = scmp.ne.s32.totalorder %s1233_s29, 0 }
 0x20b   : > { %p1242_p11 = scmp.ge.s32.totalorder %s992_s23, 2  ;;  %s586_s24 = scalar_lea.sflag [#allocation5], %s585_s17 }
 0x20d   : > { %p764_p2 = pnand %p1242_p11, %p1241_p9 }
 0x20f   : > { %p765_p13 = pneg %p764_p2 }
 0x211   : > { %967 = dma.done.wait (%p765_p13), %s586_s24, 128  }
 0x212   : > { %969 = vsyncadd (%p765_p13), %s586_s24, 4294967168  ;;  %s22_s23 = sadd.s32 1, %s992_s23   ;;  %s1243_s18 = smov %s976_s19 }
 0x213   : > { %p19_p0 = scmp.ge.s32.totalorder %s22_s23, 4   ;;  %s1244_s19 = smov %s980_s20 }
 0x214   : > { %s1245_s20 = smov %s1137_s14  ;;  %s1246_s21 = smov %s988_s22 }
 0x215   : > { %s1247_s22 = smov %s1249_s7  ;;  %21 = sbr.rel (!%p19_p0) target bundleno = 9 (0x9), region = 106 }
 0x21a   :  { %591 = vsyncpa [#allocation4], 1 }
 0x21b   :  { %593 = vsyncpa [#allocation4 + $0x1], 1 }
 0x21c   :  { %594 = vsyncpa [#allocation7], 1 }
 0x21d   :  { %595 = vsyncpa [#allocation5], 1 }
 0x21e   :  { %597 = vsyncpa [#allocation5 + $0x1], 1 }

</bundles_post_ra>
